<compile_context>
chip_gen: v7x
topology: tpu7x:2x2x1
jax: 0.10.0
libtpu: 0.0.40
codegen_flags: <defaults>
</compile_context>

<pallas_src>
import functools

import jax
import jax.numpy as jnp
from jax.experimental import pallas as pl
from jax.experimental.pallas import tpu as pltpu

LANE = 128           # TPU lane width; the tiny num_classes axis is padded to this
DEFAULT_BLOCK_B = 512  # rows per grid step once B grows (x tile = 512*128*2B = 128 KiB)


def linear_kernel(x_ref, w_ref, b_ref, o_ref):
    # x_ref: (TB, K)    bf16
    # w_ref: (K, LANE)  bf16  (columns >= num_classes are zero padding; resident)
    # b_ref: (1, LANE)  f32   (entries >= num_classes are zero padding; resident)
    # o_ref: (TB, N)    f32   (N = num_classes; only the valid columns are stored)
    acc = jnp.dot(x_ref[...], w_ref[...], preferred_element_type=jnp.float32)
    acc = acc + b_ref[...]
    n = o_ref.shape[1]
    o_ref[...] = acc[:, :n]


def prepare_params(weight, bias, lane_pad=LANE):
    """One-time parameter setup, hoisted out of the forward hot path.

    weight: (num_classes, input_size) PyTorch layout -> (input_size, lane_pad) bf16
    bias:   (num_classes,)                            -> (1, lane_pad) f32
    """
    n, k = weight.shape
    w_pad = (
        jnp.zeros((k, lane_pad), dtype=jnp.bfloat16)
        .at[:, :n]
        .set(weight.T.astype(jnp.bfloat16))
    )
    b_pad = jnp.zeros((1, lane_pad), dtype=jnp.float32).at[:, :n].set(
        bias.astype(jnp.float32)
    )
    return w_pad, b_pad


@functools.partial(jax.jit, static_argnames=("num_classes", "block_b"))
def dummy_model_forward(x, w_pad, b_pad, *, num_classes, block_b=DEFAULT_BLOCK_B):
    """x: (B, input_size) float; w_pad: (input_size, LANE) bf16; b_pad: (1, LANE) f32."""
    B, K = x.shape
    lane = w_pad.shape[1]

    # bf16 input path (halves x DMA bytes, native MXU datapath); fuses with the
    # producer of x under jit.
    x_bf16 = x.astype(jnp.bfloat16)

    # Batch-only grid: small B -> single step; large B -> block_b rows per step.
    tb = B if B <= block_b else block_b
    grid = (pl.cdiv(B, tb),)

    out = pl.pallas_call(
        linear_kernel,
        out_shape=jax.ShapeDtypeStruct((B, num_classes), jnp.float32),
        grid=grid,
        in_specs=[
            pl.BlockSpec((tb, K), lambda i: (i, 0)),      # x: tiled over batch
            pl.BlockSpec((K, lane), lambda i: (0, 0)),    # weight: fetched once, resident
            pl.BlockSpec((1, lane), lambda i: (0, 0)),    # bias: fetched once, resident
        ],
        out_specs=pl.BlockSpec((tb, num_classes), lambda i: (i, 0)),
        compiler_params=pltpu.CompilerParams(
            dimension_semantics=("parallel",),            # shard B across TCs on v7x
        ),
        cost_estimate=pl.CostEstimate(
            flops=2 * B * K * lane,
            transcendentals=0,
            bytes_accessed=2 * B * K + 2 * K * lane + 4 * lane + 4 * B * num_classes,
        ),
    )(x_bf16, w_pad, b_pad)

    return out


if __name__ == "__main__":
    num_classes = 4
    input_size = 128
    batch = 16  # multiple of 16 -> clean bf16 sublane packing

    key = jax.random.PRNGKey(0)
    kx, kw, kb = jax.random.split(key, 3)

    # Deterministic synthetic input / parameters (nn.Linear(input_size, num_classes))
    x = jax.random.normal(kx, (batch, input_size), dtype=jnp.float32)
    weight = jax.random.normal(kw, (num_classes, input_size), dtype=jnp.float32) * 0.05
    bias = jax.random.normal(kb, (num_classes,), dtype=jnp.float32) * 0.01

    # One-time parameter prep (cached as model state in real use).
    w_pad, b_pad = prepare_params(weight, bias)
    w_pad, b_pad = jax.block_until_ready((w_pad, b_pad))

    out = dummy_model_forward(x, w_pad, b_pad, num_classes=num_classes)
    out = jax.block_until_ready(out)

    # Sanity-check against pure-JAX f32 reference (tolerance relaxed for bf16 inputs).
    ref = x @ weight.T + bias
    assert out.shape == (batch, num_classes)
    assert out.dtype == jnp.float32
    assert jnp.allclose(out, ref, atol=3e-2, rtol=3e-2)

    print("KERNEL_OK")
</pallas_src>

<mosaic_0001>
module attributes {stable_mosaic.version = 11 : i64} {
  func.func @linear_kernel(%arg0: i32, %arg1: memref<16x128xbf16, #tpu.memory_space<vmem>>, %arg2: memref<128x128xbf16, #tpu.memory_space<vmem>>, %arg3: memref<1x128xf32, #tpu.memory_space<vmem>>, %arg4: memref<16x4xf32, #tpu.memory_space<vmem>>) attributes {dimension_semantics = [#tpu.dimension_semantics<parallel>], iteration_bounds = array<i64: 1>, scalar_prefetch = 0 : i64, scratch_operands = 0 : i64, tpu.core_type = #tpu.core_type<tc>, window_params = [{transform_indices = @transform_0, window_bounds = array<i64: 16, 128>}, {pipeline_mode = #tpu.pipeline_mode<synchronous>, transform_indices = @transform_1, window_bounds = array<i64: 128, 128>}, {pipeline_mode = #tpu.pipeline_mode<synchronous>, transform_indices = @transform_2, window_bounds = array<i64: 1, 128>}, {transform_indices = @transform_3, window_bounds = array<i64: 16, 4>}]} {
    %c0 = arith.constant 0 : index
    %c0_0 = arith.constant 0 : index
    %0 = vector.load %arg1[%c0, %c0_0] : memref<16x128xbf16, #tpu.memory_space<vmem>>, vector<16x128xbf16>
    %c0_1 = arith.constant 0 : index
    %c0_2 = arith.constant 0 : index
    %1 = vector.load %arg2[%c0_1, %c0_2] : memref<128x128xbf16, #tpu.memory_space<vmem>>, vector<128x128xbf16>
    %cst = arith.constant dense<0.000000e+00> : vector<16x128xf32>
    %2 = tpu.matmul %0, %1, %cst {dimension_numbers = #tpu.dot_dimension_numbers<[1], [0], [0], [1], [0, 0, 1, 1], [], []>} : vector<16x128xbf16>, vector<128x128xbf16>, vector<16x128xf32> -> vector<16x128xf32>
    %c0_3 = arith.constant 0 : index
    %c0_4 = arith.constant 0 : index
    %3 = vector.load %arg3[%c0_3, %c0_4] : memref<1x128xf32, #tpu.memory_space<vmem>>, vector<1x128xf32>
    %4 = vector.broadcast %3 : vector<1x128xf32> to vector<16x128xf32>
    %5 = arith.addf %2, %4 : vector<16x128xf32>
    %6 = vector.extract_strided_slice %5 {offsets = [0, 0], sizes = [16, 4], strides = [1, 1]} : vector<16x128xf32> to vector<16x4xf32>
    %c0_5 = arith.constant 0 : index
    %c0_6 = arith.constant 0 : index
    %7 = vector.load %arg4[%c0_5, %c0_6] : memref<16x4xf32, #tpu.memory_space<vmem>>, vector<16x4xf32>
    tpu.vector_store %arg4[%c0_5, %c0_6], %6 {strides = array<i32>} : memref<16x4xf32, #tpu.memory_space<vmem>>, vector<16x4xf32>,
    return
  }
  func.func @transform_0(%arg0: i32) -> (i32, i32) {
    %c0_i32 = arith.constant 0 : i32
    %c0_i32_0 = arith.constant 0 : i32
    return %arg0, %c0_i32 : i32, i32
  }
  func.func @transform_1(%arg0: i32) -> (i32, i32) {
    %c0_i32 = arith.constant 0 : i32
    %c0_i32_0 = arith.constant 0 : i32
    %c0_i32_1 = arith.constant 0 : i32
    return %c0_i32, %c0_i32_0 : i32, i32
  }
  func.func @transform_2(%arg0: i32) -> (i32, i32) {
    %c0_i32 = arith.constant 0 : i32
    %c0_i32_0 = arith.constant 0 : i32
    %c0_i32_1 = arith.constant 0 : i32
    return %c0_i32, %c0_i32_0 : i32, i32
  }
  func.func @transform_3(%arg0: i32) -> (i32, i32) {
    %c0_i32 = arith.constant 0 : i32
    %c0_i32_0 = arith.constant 0 : i32
    return %arg0, %c0_i32 : i32, i32
  }
}

</mosaic_0001>

<bundles_post_ra>
// kernel: dummy_model_forward.1
= control target key start
LH: loop header
LB: loop body
LE: loop exit
PB: predicated region body
PF: predicated region fallthrough
CT: control target
= control target key end

     0   :  { %8 = vsyncpa [#allocation3], 0  ;;  %s234_s12 = smov [#allocation2]   ;;  %s283_s0 = inlined_call_operand.vmem [shape: bf16[16,128], index: 0, kind: input, shape index: {}]   ;;  %s284_s1 = inlined_call_operand.hbm [shape: bf16[128,128], index: 1, kind: input, shape index: {}]   ;;  %s285_s2 = inlined_call_operand.vmem [shape: f32[1,128], index: 2, kind: input, shape index: {}]   ;;  %s286_s3 = inlined_call_operand.vmem [shape: f32[16,4], index: 3, kind: output, shape index: {}]  }
   0x1   :  { %s16_s13 = sshll.u32 %s234_s12, 4  ;;  %s210_s16 = scalar_lea.hbm %s284_s1, 1024  ;;  %s17_s13 = int_to_ptr.vmem [resolvable:$true] %s16_s13 }
   0x2   :  { %p211_p0 = scmp.ne.s32.totalorder %s284_s1, %s210_s16  ;;  %p214_p1 = scmp.lt.u32.totalorder %s210_s16, %s284_s1 }
   0x4   :  { %p216_p2 = pnand %p214_p1, %p211_p0 }
   0x6   :  { %219 = shalt.err (!%p216_p2)
}
   0x7   :  { %s220_s21 = scalar_lea.vmem %s17_s13, 1024  ;;  %p225_p4 = scmp.lt.s32.totalorder %s17_s13, %s17_s13 }
   0x8   :  { %p221_p3 = scmp.ne.s32.totalorder %s17_s13, %s220_s21  ;;  %p226_p5 = scmp.lt.s32.totalorder %s220_s21, %s220_s21 }
   0xa   :  { %p227_p6 = por %p226_p5, %p225_p4 }
   0xc   :  { %p228_p7 = pnand %p227_p6, %p221_p3 }
   0xe   :  { %231 = shalt.err (!%p228_p7)
}
   0xf   :  { %s235_s22 = smov 64   ;;  %s236_s23 = smov 4  }
  0x10   :  { %22 = dma.hbm_to_vmem [thread:$0]  %s284_s1, 1024, %s17_s13, [#allocation3], %s235_s22, %s235_s22, %s236_s23  }
  0x11   :  { %232 = dma.done.wait [#allocation3], 1024  }
  0x12   :  { %233 = vsyncadd [#allocation3], 4294966272  ;;  %v237_v0 = vmov 0.0   ;;  %vm238_vm0 = vmmov 0   ;;  %v201_v1 = vld [vmem:[#allocation2] sm:$0xff]   ;;  %v202_v2 = vld [vmem:[#allocation2 + $0x8] sm:$0xff]  }
  0x13   :  { %176 = vmatprep.subr.bf16.mxu0 %v237_v0  ;;  %192 = vmatprep.mubr.msk.bf16.mxu0 %vm238_vm0, %v237_v0  ;;  %v203_v3 = vld [vmem:[#allocation2 + $0x10] sm:$0xff]   ;;  %v204_v4 = vld [vmem:[#allocation2 + $0x18] sm:$0xff]   ;;  %v205_v5 = vld [vmem:[#allocation2 + $0x20] sm:$0xff]   ;;  %vm149_vm1 = vcmask 31744  }
  0x14   :  { %177 = vmatpush3.bf16.msra.mxu0 %v201_v1  ;;  %v206_v6 = vld [vmem:[#allocation2 + $0x28] sm:$0xff]   ;;  %v207_v7 = vld [vmem:[#allocation2 + $0x30] sm:$0xff]   ;;  %v208_v8 = vld [vmem:[#allocation2 + $0x38] sm:$0xff]  }
  0x15   :  { %178 = vmatprep.subr.bf16.mxu0 %v237_v0  ;;  %v209_v9 = vld [vmem:[%s283_s0] sm:$0xff]  }
  0x16   :  { %v157_v10 = vld [vmem:[%s285_s2] ss:$0 sm:$0xff] }
  0x18   :  { %179 = vmatpush3.bf16.msra.mxu0 %v202_v2 }
  0x19   :  { %180 = vmatprep.subr.bf16.mxu0 %v237_v0 }
  0x1c   :  { %181 = vmatpush3.bf16.msra.mxu0 %v203_v3 }
  0x1d   :  { %182 = vmatprep.subr.bf16.mxu0 %v237_v0 }
  0x20   :  { %183 = vmatpush3.bf16.msra.mxu0 %v204_v4 }
  0x21   :  { %184 = vmatprep.subr.bf16.mxu0 %v237_v0 }
  0x24   :  { %185 = vmatpush3.bf16.msra.mxu0 %v205_v5 }
  0x25   :  { %186 = vmatprep.subr.bf16.mxu0 %v237_v0 }
  0x28   :  { %187 = vmatpush3.bf16.msra.mxu0 %v206_v6 }
  0x29   :  { %188 = vmatprep.subr.bf16.mxu0 %v237_v0 }
  0x2c   :  { %189 = vmatpush3.bf16.msra.mxu0 %v207_v7 }
  0x2d   :  { %190 = vmatprep.subr.bf16.mxu0 %v237_v0 }
  0x30   :  { %191 = vmatpush3.bf16.msra.mxu0 %v208_v8 }
  0x33   :  { %193 = vmatmul.mubr.bf16.vlgmr.msra.gmra.mrb[0].mxu0 %v209_v9 }
 0x106   :  { %v142_v11 = vpop.f32.mrb[0].mxu0 }
 0x107   :  { %v143_v12 = vadd.f32 %v157_v10, %v142_v11  ;;  %v194_v13 = vpop.f32.mrb[1].mxu0 }
 0x108   :  { %v145_v14 = vpop.f32.mrb[2].mxu0 }
 0x109   :  { %150 = vst.msk [vmem:[%s286_s3] sm:$0xff] %vm149_vm1, %v143_v12  ;;  %v146_v15 = vadd.f32 %v157_v10, %v145_v14  ;;  %v195_v16 = vpop.f32.mrb[3].mxu0 }
 0x10b   :  { %151 = vst.msk [vmem:[%s286_s3 + $0x8] sm:$0xff] %vm149_vm1, %v146_v15 }
 0x10c   :  { %156 = vsyncpa [#allocation3], 1 }

</bundles_post_ra>
